<compile_context>
chip_gen: v6e
topology: v6e:2x2x1
jax: 0.10.0
libtpu: 0.0.40
codegen_flags: <defaults>
</compile_context>

<pallas_src>
import jax
import jax.numpy as jnp
from jax.experimental import pallas as pl
from jax.experimental.pallas import tpu as pltpu

# ---- module hyper-parameters (LGHLoss.__init__ defaults) --------------------
SCALE = 1.0
MARGIN = 0.0
LMBD = 0.5
LS_LOGITS = 1.0
LS_HASH = 1.0
LS_BIN = 1.0
LS_CONT = 1.0

# VMEM budget for the double-buffered input tiles and the scoped-VMEM ceiling
# we request.  16 MiB of input buffers + compiler scratch stays well under the
# 32 MiB limit, which is safe on v5e (128 MiB phys), v6e (128 MiB) and v7x
# (64 MiB).
_VMEM_INPUT_BUDGET = 16 * 1024 * 1024
_VMEM_LIMIT_BYTES = 32 * 1024 * 1024


def _make_kernel(b_total):
    """Build the kernel closed over the true (unpadded) batch size."""

    def kernel(labels_ref, logits_ref, cont_ref, bin_ref, codes_ref,
               total_ref, quan_ref, acc_ref):
        pid = pl.program_id(0)

        @pl.when(pid == 0)
        def _():
            acc_ref[0] = 0.0  # sum of per-row total loss
            acc_ref[1] = 0.0  # sum of per-row cosine similarity

        tb, c = logits_ref.shape

        labels = labels_ref[...]                                   # [TB,1] i32
        col = jax.lax.broadcasted_iota(jnp.int32, (tb, c), 1)
        lbl_mask = col == labels                                   # [TB,C] bool

        # Mask rows past the true batch size (uneven last tile).
        row = jax.lax.broadcasted_iota(jnp.int32, (tb, 1), 0) + pid * tb
        valid = row < b_total                                      # [TB,1] bool

        def ce_stats(raw):
            # compute_margin_logits + per-row cross entropy (int-label path).
            lm = raw.astype(jnp.float32)
            if MARGIN != 0.0:  # trace-time constant; elided for default config
                lm = lm - jnp.where(lbl_mask, jnp.float32(MARGIN), 0.0)
            if SCALE != 1.0:   # trace-time constant; elided for default config
                lm = lm * jnp.float32(SCALE)
            m = jnp.max(lm, axis=-1, keepdims=True)                # [TB,1]
            se = jnp.sum(jnp.exp(lm - m), axis=-1, keepdims=True)  # [TB,1]
            lse = m + jnp.log(se)                                  # [TB,1]
            tgt = jnp.sum(jnp.where(lbl_mask, lm, 0.0),
                          axis=-1, keepdims=True)                  # [TB,1]
            return lse - tgt, tgt - lse     # (CE, log-softmax at the label)

        ce_l, _ = ce_stats(logits_ref[...])
        ce_c, lsm_c = ce_stats(cont_ref[...])
        ce_b, lsm_b = ce_stats(bin_ref[...])

        # hash loss (avg_before_softmax=False): only the label column of the
        # mixed softmax survives the onehot contraction, so reuse the CE
        # intermediates; clamp the *mixed* probability at 1e-7.
        p_lbl = LMBD * jnp.exp(lsm_c) + (1.0 - LMBD) * jnp.exp(lsm_b)
        hash_row = -jnp.log(jnp.maximum(p_lbl, 1e-7))              # [TB,1]

        row_total = (LS_LOGITS * ce_l + LS_CONT * ce_c + LS_BIN * ce_b
                     + LS_HASH * hash_row)                         # [TB,1]

        # quantization diagnostic: cosine(codes, sign(codes)) per row.
        #   codes . sign(codes) == sum(|codes|);  ||sign(codes)||^2 == #nonzero
        codes = codes_ref[...].astype(jnp.float32)
        abs_c = jnp.abs(codes)
        dot = jnp.sum(abs_c, axis=-1, keepdims=True)               # [TB,1]
        n1 = jnp.maximum(
            jnp.sqrt(jnp.sum(codes * codes, axis=-1, keepdims=True)), 1e-8)
        nnz = jnp.sum((abs_c > 0.0).astype(jnp.float32),
                      axis=-1, keepdims=True)
        n2 = jnp.maximum(jnp.sqrt(nnz), 1e-8)
        cos_row = dot / (n1 * n2)                                  # [TB,1]

        # Select (not multiply) so garbage in padded rows can never NaN the sum.
        acc_ref[0] += jnp.sum(jnp.where(valid, row_total, 0.0))
        acc_ref[1] += jnp.sum(jnp.where(valid, cos_row, 0.0))

        @pl.when(pid == pl.num_programs(0) - 1)
        def _():
            inv_b = jnp.float32(1.0 / b_total)
            total_ref[0, 0] = acc_ref[0] * inv_b
            quan_ref[0, 0] = 1.0 - acc_ref[1] * inv_b

    return kernel


def lgh_loss(logits, logits_cont, logits_bin, codes, labels, *, tb=None):
    """Returns (total_loss, quan_sim) as [1,1] float32 arrays.

    `tb` is the batch tile.  By default it is derived from a VMEM budget so
    that 3 (logits) x 2 (double-buffer) x tb x C x dtype_bytes (+codes) fits
    comfortably under the scoped-VMEM limit on every chip generation.
    """
    B, C = logits.shape
    NBITS = codes.shape[-1]

    row_bytes = (3 * C * jnp.dtype(logits.dtype).itemsize
                 + NBITS * jnp.dtype(codes.dtype).itemsize + 4)
    auto_tb = max(8, ((_VMEM_INPUT_BUDGET // (2 * row_bytes)) // 8) * 8)
    if tb is None:
        tb = auto_tb
    if tb >= B:
        tb = B                           # single tile == full array (always legal)
    else:
        tb = max(8, (tb // 8) * 8)       # keep sublane alignment when tiling
    ntiles = pl.cdiv(B, tb)

    labels2d = labels.astype(jnp.int32).reshape(B, 1)
    kernel = _make_kernel(B)

    total, quan = pl.pallas_call(
        kernel,
        out_shape=(jax.ShapeDtypeStruct((1, 1), jnp.float32),
                   jax.ShapeDtypeStruct((1, 1), jnp.float32)),
        grid=(ntiles,),
        in_specs=[
            pl.BlockSpec((tb, 1), lambda i: (i, 0)),        # labels
            pl.BlockSpec((tb, C), lambda i: (i, 0)),        # logits
            pl.BlockSpec((tb, C), lambda i: (i, 0)),        # logits_cont
            pl.BlockSpec((tb, C), lambda i: (i, 0)),        # logits_bin
            pl.BlockSpec((tb, NBITS), lambda i: (i, 0)),    # codes
        ],
        out_specs=(
            pl.BlockSpec(memory_space=pltpu.MemorySpace.SMEM),
            pl.BlockSpec(memory_space=pltpu.MemorySpace.SMEM),
        ),
        scratch_shapes=[pltpu.SMEM((2,), jnp.float32)],
        compiler_params=pltpu.CompilerParams(
            dimension_semantics=("arbitrary",),
            vmem_limit_bytes=_VMEM_LIMIT_BYTES),
    )(labels2d, logits, logits_cont, logits_bin, codes)
    return total, quan


def _reference(logits, cont, binl, codes, labels):
    """Pure-JAX mirror of the PyTorch forward (default config)."""
    C = logits.shape[-1]
    onehot = jax.nn.one_hot(labels, C, dtype=jnp.float32)
    logits = logits.astype(jnp.float32)
    cont = cont.astype(jnp.float32)
    binl = binl.astype(jnp.float32)
    codes = codes.astype(jnp.float32)

    def margin_logits(l):
        return SCALE * (l - MARGIN * onehot)

    def ce(l):
        lm = margin_logits(l)
        lse = jax.scipy.special.logsumexp(lm, axis=-1)
        tgt = jnp.sum(onehot * lm, axis=-1)
        return jnp.mean(lse - tgt)

    prob = LMBD * jax.nn.softmax(margin_logits(cont), axis=-1) \
        + (1.0 - LMBD) * jax.nn.softmax(margin_logits(binl), axis=-1)
    hash_loss = jnp.mean(-jnp.sum(onehot * jnp.log(jnp.maximum(prob, 1e-7)),
                                  axis=-1))
    sgn = jnp.sign(codes)
    cos = jnp.sum(codes * sgn, -1) / (
        jnp.maximum(jnp.linalg.norm(codes, axis=-1), 1e-8)
        * jnp.maximum(jnp.linalg.norm(sgn, axis=-1), 1e-8))
    quan = 1.0 - jnp.mean(cos)
    total = ce(logits) + hash_loss + ce(cont) + ce(binl)
    return total, quan


if __name__ == "__main__":
    B, C, NBITS = 16, 16, 32  # batch, num_classes, hash-code bits
    key = jax.random.PRNGKey(0)
    k1, k2, k3, k4, k5 = jax.random.split(key, 5)
    # cosine-similarity style logits are bounded; keep inputs in [-1, 1]-ish
    logits = jax.random.uniform(k1, (B, C), jnp.float32, -1.0, 1.0)
    logits_cont = jax.random.uniform(k2, (B, C), jnp.float32, -1.0, 1.0)
    logits_bin = jax.random.uniform(k3, (B, C), jnp.float32, -1.0, 1.0)
    codes = jax.random.normal(k4, (B, NBITS), jnp.float32)
    labels = jax.random.randint(k5, (B,), 0, C, jnp.int32)

    ref_total, ref_quan = _reference(logits, logits_cont, logits_bin, codes,
                                     labels)

    # tb=8 -> 2-step batch-tiled grid, exercising the accumulator path.
    total, quan = lgh_loss(logits, logits_cont, logits_bin, codes, labels,
                           tb=8)
    jax.block_until_ready((total, quan))
    assert jnp.allclose(total[0, 0], ref_total, rtol=1e-5, atol=1e-5), (
        total[0, 0], ref_total)
    assert jnp.allclose(quan[0, 0], ref_quan, rtol=1e-5, atol=1e-5), (
        quan[0, 0], ref_quan)

    # auto tile -> single-tile path (tb clipped to B).
    total2, quan2 = lgh_loss(logits, logits_cont, logits_bin, codes, labels)
    jax.block_until_ready((total2, quan2))
    assert jnp.allclose(total2[0, 0], ref_total, rtol=1e-5, atol=1e-5), (
        total2[0, 0], ref_total)
    assert jnp.allclose(quan2[0, 0], ref_quan, rtol=1e-5, atol=1e-5), (
        quan2[0, 0], ref_quan)

    print("KERNEL_OK")
</pallas_src>

<mosaic_0001>
module attributes {stable_mosaic.version = 11 : i64} {
  func.func @kernel(%arg0: i32, %arg1: memref<8x1xi32, #tpu.memory_space<vmem>>, %arg2: memref<8x16xf32, #tpu.memory_space<vmem>>, %arg3: memref<8x16xf32, #tpu.memory_space<vmem>>, %arg4: memref<8x16xf32, #tpu.memory_space<vmem>>, %arg5: memref<8x32xf32, #tpu.memory_space<vmem>>, %arg6: memref<1x1xf32, #tpu.memory_space<smem>>, %arg7: memref<1x1xf32, #tpu.memory_space<smem>>, %arg8: memref<2xf32, #tpu.memory_space<smem>>) attributes {dimension_semantics = [#tpu.dimension_semantics<arbitrary>], iteration_bounds = array<i64: 2>, scalar_prefetch = 0 : i64, scratch_operands = 1 : i64, tpu.core_type = #tpu.core_type<tc>, window_params = [{transform_indices = @transform_0, window_bounds = array<i64: 8, 1>}, {transform_indices = @transform_1, window_bounds = array<i64: 8, 16>}, {transform_indices = @transform_2, window_bounds = array<i64: 8, 16>}, {transform_indices = @transform_3, window_bounds = array<i64: 8, 16>}, {transform_indices = @transform_4, window_bounds = array<i64: 8, 32>}, {transform_indices = @transform_5, window_bounds = array<i64: 1, 1>}, {transform_indices = @transform_6, window_bounds = array<i64: 1, 1>}]} {
    %c0_i32 = arith.constant 0 : i32
    %0 = arith.cmpi eq, %arg0, %c0_i32 : i32
    %1 = arith.extui %0 : i1 to i32
    %c0_i32_0 = arith.constant 0 : i32
    %2 = arith.cmpi ne, %1, %c0_i32_0 : i32
    scf.if %2 {
      %cst_43 = arith.constant 0.000000e+00 : f32
      %c0_44 = arith.constant 0 : index
      %125 = memref.load %arg8[%c0_44] : memref<2xf32, #tpu.memory_space<smem>>
      memref.store %cst_43, %arg8[%c0_44] : memref<2xf32, #tpu.memory_space<smem>>
      %cst_45 = arith.constant 0.000000e+00 : f32
      %c1_46 = arith.constant 1 : index
      %126 = memref.load %arg8[%c1_46] : memref<2xf32, #tpu.memory_space<smem>>
      memref.store %cst_45, %arg8[%c1_46] : memref<2xf32, #tpu.memory_space<smem>>
    } else {
    }
    %c0 = arith.constant 0 : index
    %c0_1 = arith.constant 0 : index
    %3 = vector.load %arg1[%c0, %c0_1] : memref<8x1xi32, #tpu.memory_space<vmem>>, vector<8x1xi32>
    %4 = tpu.iota {dimensions = array<i32: 1>} : vector<8x16xi32>
    %5 = vector.broadcast %3 : vector<8x1xi32> to vector<8x16xi32>
    %6 = arith.cmpi eq, %4, %5 : vector<8x16xi32>
    %7 = tpu.iota {dimensions = array<i32: 0>} : vector<8x1xi32>
    %c8_i32 = arith.constant 8 : i32
    %8 = arith.muli %arg0, %c8_i32 : i32
    %9 = vector.broadcast %8 : i32 to vector<8x1xi32>
    %10 = arith.addi %7, %9 : vector<8x1xi32>
    %c16_i32 = arith.constant 16 : i32
    %11 = vector.broadcast %c16_i32 : i32 to vector<8x1xi32>
    %12 = arith.cmpi slt, %10, %11 : vector<8x1xi32>
    %c0_2 = arith.constant 0 : index
    %c0_3 = arith.constant 0 : index
    %13 = vector.load %arg2[%c0_2, %c0_3] : memref<8x16xf32, #tpu.memory_space<vmem>>, vector<8x16xf32>
    %cst = arith.constant dense<0xFF800000> : vector<8xf32>
    %14 = vector.multi_reduction <maximumf>, %13, %cst [1] : vector<8x16xf32> to vector<8xf32>
    %15 = vector.shape_cast %14 : vector<8xf32> to vector<8x1xf32>
    %16 = vector.broadcast %15 : vector<8x1xf32> to vector<8x16xf32>
    %17 = arith.subf %13, %16 : vector<8x16xf32>
    %18 = math.exp %17 : vector<8x16xf32>
    %cst_4 = arith.constant dense<0.000000e+00> : vector<8xf32>
    %19 = vector.multi_reduction <add>, %18, %cst_4 [1] : vector<8x16xf32> to vector<8xf32>
    %20 = vector.shape_cast %19 : vector<8xf32> to vector<8x1xf32>
    %21 = math.log %20 : vector<8x1xf32>
    %22 = arith.addf %15, %21 : vector<8x1xf32>
    %cst_5 = arith.constant 0.000000e+00 : f32
    %23 = vector.broadcast %cst_5 : f32 to vector<8x16xf32>
    %24 = arith.select %6, %13, %23 : vector<8x16xi1>, vector<8x16xf32>
    %cst_6 = arith.constant dense<0.000000e+00> : vector<8xf32>
    %25 = vector.multi_reduction <add>, %24, %cst_6 [1] : vector<8x16xf32> to vector<8xf32>
    %26 = vector.shape_cast %25 : vector<8xf32> to vector<8x1xf32>
    %27 = arith.subf %22, %26 : vector<8x1xf32>
    %c0_7 = arith.constant 0 : index
    %c0_8 = arith.constant 0 : index
    %28 = vector.load %arg3[%c0_7, %c0_8] : memref<8x16xf32, #tpu.memory_space<vmem>>, vector<8x16xf32>
    %cst_9 = arith.constant dense<0xFF800000> : vector<8xf32>
    %29 = vector.multi_reduction <maximumf>, %28, %cst_9 [1] : vector<8x16xf32> to vector<8xf32>
    %30 = vector.shape_cast %29 : vector<8xf32> to vector<8x1xf32>
    %31 = vector.broadcast %30 : vector<8x1xf32> to vector<8x16xf32>
    %32 = arith.subf %28, %31 : vector<8x16xf32>
    %33 = math.exp %32 : vector<8x16xf32>
    %cst_10 = arith.constant dense<0.000000e+00> : vector<8xf32>
    %34 = vector.multi_reduction <add>, %33, %cst_10 [1] : vector<8x16xf32> to vector<8xf32>
    %35 = vector.shape_cast %34 : vector<8xf32> to vector<8x1xf32>
    %36 = math.log %35 : vector<8x1xf32>
    %37 = arith.addf %30, %36 : vector<8x1xf32>
    %cst_11 = arith.constant 0.000000e+00 : f32
    %38 = vector.broadcast %cst_11 : f32 to vector<8x16xf32>
    %39 = arith.select %6, %28, %38 : vector<8x16xi1>, vector<8x16xf32>
    %cst_12 = arith.constant dense<0.000000e+00> : vector<8xf32>
    %40 = vector.multi_reduction <add>, %39, %cst_12 [1] : vector<8x16xf32> to vector<8xf32>
    %41 = vector.shape_cast %40 : vector<8xf32> to vector<8x1xf32>
    %42 = arith.subf %37, %41 : vector<8x1xf32>
    %43 = arith.subf %41, %37 : vector<8x1xf32>
    %c0_13 = arith.constant 0 : index
    %c0_14 = arith.constant 0 : index
    %44 = vector.load %arg4[%c0_13, %c0_14] : memref<8x16xf32, #tpu.memory_space<vmem>>, vector<8x16xf32>
    %cst_15 = arith.constant dense<0xFF800000> : vector<8xf32>
    %45 = vector.multi_reduction <maximumf>, %44, %cst_15 [1] : vector<8x16xf32> to vector<8xf32>
    %46 = vector.shape_cast %45 : vector<8xf32> to vector<8x1xf32>
    %47 = vector.broadcast %46 : vector<8x1xf32> to vector<8x16xf32>
    %48 = arith.subf %44, %47 : vector<8x16xf32>
    %49 = math.exp %48 : vector<8x16xf32>
    %cst_16 = arith.constant dense<0.000000e+00> : vector<8xf32>
    %50 = vector.multi_reduction <add>, %49, %cst_16 [1] : vector<8x16xf32> to vector<8xf32>
    %51 = vector.shape_cast %50 : vector<8xf32> to vector<8x1xf32>
    %52 = math.log %51 : vector<8x1xf32>
    %53 = arith.addf %46, %52 : vector<8x1xf32>
    %cst_17 = arith.constant 0.000000e+00 : f32
    %54 = vector.broadcast %cst_17 : f32 to vector<8x16xf32>
    %55 = arith.select %6, %44, %54 : vector<8x16xi1>, vector<8x16xf32>
    %cst_18 = arith.constant dense<0.000000e+00> : vector<8xf32>
    %56 = vector.multi_reduction <add>, %55, %cst_18 [1] : vector<8x16xf32> to vector<8xf32>
    %57 = vector.shape_cast %56 : vector<8xf32> to vector<8x1xf32>
    %58 = arith.subf %53, %57 : vector<8x1xf32>
    %59 = arith.subf %57, %53 : vector<8x1xf32>
    %60 = math.exp %43 : vector<8x1xf32>
    %cst_19 = arith.constant 5.000000e-01 : f32
    %61 = vector.broadcast %cst_19 : f32 to vector<8x1xf32>
    %62 = arith.mulf %61, %60 : vector<8x1xf32>
    %63 = math.exp %59 : vector<8x1xf32>
    %cst_20 = arith.constant 5.000000e-01 : f32
    %64 = vector.broadcast %cst_20 : f32 to vector<8x1xf32>
    %65 = arith.mulf %64, %63 : vector<8x1xf32>
    %66 = arith.addf %62, %65 : vector<8x1xf32>
    %cst_21 = arith.constant 1.000000e-07 : f32
    %67 = vector.broadcast %cst_21 : f32 to vector<8x1xf32>
    %68 = arith.maximumf %66, %67 : vector<8x1xf32>
    %69 = math.log %68 : vector<8x1xf32>
    %cst_22 = arith.constant 0.000000e+00 : f32
    %70 = vector.broadcast %cst_22 : f32 to vector<8x1xf32>
    %71 = arith.subf %70, %69 : vector<8x1xf32>
    %cst_23 = arith.constant 1.000000e+00 : f32
    %72 = vector.broadcast %cst_23 : f32 to vector<8x1xf32>
    %73 = arith.mulf %72, %27 : vector<8x1xf32>
    %cst_24 = arith.constant 1.000000e+00 : f32
    %74 = vector.broadcast %cst_24 : f32 to vector<8x1xf32>
    %75 = arith.mulf %74, %42 : vector<8x1xf32>
    %76 = arith.addf %73, %75 : vector<8x1xf32>
    %cst_25 = arith.constant 1.000000e+00 : f32
    %77 = vector.broadcast %cst_25 : f32 to vector<8x1xf32>
    %78 = arith.mulf %77, %58 : vector<8x1xf32>
    %79 = arith.addf %76, %78 : vector<8x1xf32>
    %cst_26 = arith.constant 1.000000e+00 : f32
    %80 = vector.broadcast %cst_26 : f32 to vector<8x1xf32>
    %81 = arith.mulf %80, %71 : vector<8x1xf32>
    %82 = arith.addf %79, %81 : vector<8x1xf32>
    %c0_27 = arith.constant 0 : index
    %c0_28 = arith.constant 0 : index
    %83 = vector.load %arg5[%c0_27, %c0_28] : memref<8x32xf32, #tpu.memory_space<vmem>>, vector<8x32xf32>
    %84 = math.absf %83 : vector<8x32xf32>
    %cst_29 = arith.constant dense<0.000000e+00> : vector<8xf32>
    %85 = vector.multi_reduction <add>, %84, %cst_29 [1] : vector<8x32xf32> to vector<8xf32>
    %86 = vector.shape_cast %85 : vector<8xf32> to vector<8x1xf32>
    %87 = arith.mulf %83, %83 : vector<8x32xf32>
    %cst_30 = arith.constant dense<0.000000e+00> : vector<8xf32>
    %88 = vector.multi_reduction <add>, %87, %cst_30 [1] : vector<8x32xf32> to vector<8xf32>
    %89 = vector.shape_cast %88 : vector<8xf32> to vector<8x1xf32>
    %90 = math.sqrt %89 : vector<8x1xf32>
    %cst_31 = arith.constant 9.99999993E-9 : f32
    %91 = vector.broadcast %cst_31 : f32 to vector<8x1xf32>
    %92 = arith.maximumf %90, %91 : vector<8x1xf32>
    %cst_32 = arith.constant 0.000000e+00 : f32
    %93 = vector.broadcast %cst_32 : f32 to vector<8x32xf32>
    %94 = arith.cmpf ogt, %84, %93 : vector<8x32xf32>
    %95 = arith.extui %94 : vector<8x32xi1> to vector<8x32xi32>
    %96 = arith.sitofp %95 : vector<8x32xi32> to vector<8x32xf32>
    %cst_33 = arith.constant dense<0.000000e+00> : vector<8xf32>
    %97 = vector.multi_reduction <add>, %96, %cst_33 [1] : vector<8x32xf32> to vector<8xf32>
    %98 = vector.shape_cast %97 : vector<8xf32> to vector<8x1xf32>
    %99 = math.sqrt %98 : vector<8x1xf32>
    %cst_34 = arith.constant 9.99999993E-9 : f32
    %100 = vector.broadcast %cst_34 : f32 to vector<8x1xf32>
    %101 = arith.maximumf %99, %100 : vector<8x1xf32>
    %102 = arith.mulf %92, %101 : vector<8x1xf32>
    %103 = arith.divf %86, %102 : vector<8x1xf32>
    %c0_35 = arith.constant 0 : index
    %104 = memref.load %arg8[%c0_35] : memref<2xf32, #tpu.memory_space<smem>>
    %cst_36 = arith.constant 0.000000e+00 : f32
    %105 = vector.broadcast %cst_36 : f32 to vector<8x1xf32>
    %106 = arith.select %12, %82, %105 : vector<8x1xi1>, vector<8x1xf32>
    %107 = vector.shape_cast %106 : vector<8x1xf32> to vector<1x8x1xf32>
    %cst_37 = arith.constant dense<0.000000e+00> : vector<1xf32>
    %108 = vector.multi_reduction <add>, %107, %cst_37 [1, 2] : vector<1x8x1xf32> to vector<1xf32>
    %109 = vector.shape_cast %108 : vector<1xf32> to vector<1x1x1xf32>
    %110 = vector.extract %109[0, 0, 0] : f32 from vector<1x1x1xf32>
    %111 = arith.addf %104, %110 : f32
    %c0_38 = arith.constant 0 : index
    %112 = memref.load %arg8[%c0_38] : memref<2xf32, #tpu.memory_space<smem>>
    memref.store %111, %arg8[%c0_38] : memref<2xf32, #tpu.memory_space<smem>>
    %c1 = arith.constant 1 : index
    %113 = memref.load %arg8[%c1] : memref<2xf32, #tpu.memory_space<smem>>
    %cst_39 = arith.constant 0.000000e+00 : f32
    %114 = vector.broadcast %cst_39 : f32 to vector<8x1xf32>
    %115 = arith.select %12, %103, %114 : vector<8x1xi1>, vector<8x1xf32>
    %116 = vector.shape_cast %115 : vector<8x1xf32> to vector<1x8x1xf32>
    %cst_40 = arith.constant dense<0.000000e+00> : vector<1xf32>
    %117 = vector.multi_reduction <add>, %116, %cst_40 [1, 2] : vector<1x8x1xf32> to vector<1xf32>
    %118 = vector.shape_cast %117 : vector<1xf32> to vector<1x1x1xf32>
    %119 = vector.extract %118[0, 0, 0] : f32 from vector<1x1x1xf32>
    %120 = arith.addf %113, %119 : f32
    %c1_41 = arith.constant 1 : index
    %121 = memref.load %arg8[%c1_41] : memref<2xf32, #tpu.memory_space<smem>>
    memref.store %120, %arg8[%c1_41] : memref<2xf32, #tpu.memory_space<smem>>
    %c1_i32 = arith.constant 1 : i32
    %122 = arith.cmpi eq, %arg0, %c1_i32 : i32
    %123 = arith.extui %122 : i1 to i32
    %c0_i32_42 = arith.constant 0 : i32
    %124 = arith.cmpi ne, %123, %c0_i32_42 : i32
    scf.if %124 {
      %c0_43 = arith.constant 0 : index
      %125 = memref.load %arg8[%c0_43] : memref<2xf32, #tpu.memory_space<smem>>
      %cst_44 = arith.constant 6.250000e-02 : f32
      %126 = arith.mulf %125, %cst_44 : f32
      %c0_45 = arith.constant 0 : index
      %c0_46 = arith.constant 0 : index
      %127 = memref.load %arg6[%c0_45, %c0_46] : memref<1x1xf32, #tpu.memory_space<smem>>
      memref.store %126, %arg6[%c0_45, %c0_46] : memref<1x1xf32, #tpu.memory_space<smem>>
      %c1_47 = arith.constant 1 : index
      %128 = memref.load %arg8[%c1_47] : memref<2xf32, #tpu.memory_space<smem>>
      %cst_48 = arith.constant 6.250000e-02 : f32
      %129 = arith.mulf %128, %cst_48 : f32
      %cst_49 = arith.constant 1.000000e+00 : f32
      %130 = arith.subf %cst_49, %129 : f32
      %c0_50 = arith.constant 0 : index
      %c0_51 = arith.constant 0 : index
      %131 = memref.load %arg7[%c0_50, %c0_51] : memref<1x1xf32, #tpu.memory_space<smem>>
      memref.store %130, %arg7[%c0_50, %c0_51] : memref<1x1xf32, #tpu.memory_space<smem>>
    } else {
    }
    return
  }
  func.func @transform_0(%arg0: i32) -> (i32, i32) {
    %c0_i32 = arith.constant 0 : i32
    %c0_i32_0 = arith.constant 0 : i32
    return %arg0, %c0_i32 : i32, i32
  }
  func.func @transform_1(%arg0: i32) -> (i32, i32) {
    %c0_i32 = arith.constant 0 : i32
    %c0_i32_0 = arith.constant 0 : i32
    return %arg0, %c0_i32 : i32, i32
  }
  func.func @transform_2(%arg0: i32) -> (i32, i32) {
    %c0_i32 = arith.constant 0 : i32
    %c0_i32_0 = arith.constant 0 : i32
    return %arg0, %c0_i32 : i32, i32
  }
  func.func @transform_3(%arg0: i32) -> (i32, i32) {
    %c0_i32 = arith.constant 0 : i32
    %c0_i32_0 = arith.constant 0 : i32
    return %arg0, %c0_i32 : i32, i32
  }
  func.func @transform_4(%arg0: i32) -> (i32, i32) {
    %c0_i32 = arith.constant 0 : i32
    %c0_i32_0 = arith.constant 0 : i32
    return %arg0, %c0_i32 : i32, i32
  }
  func.func @transform_5(%arg0: i32) -> (i32, i32) {
    %c0_i32 = arith.constant 0 : i32
    %c0_i32_0 = arith.constant 0 : i32
    %c0_i32_1 = arith.constant 0 : i32
    return %c0_i32, %c0_i32_0 : i32, i32
  }
  func.func @transform_6(%arg0: i32) -> (i32, i32) {
    %c0_i32 = arith.constant 0 : i32
    %c0_i32_0 = arith.constant 0 : i32
    %c0_i32_1 = arith.constant 0 : i32
    return %c0_i32, %c0_i32_0 : i32, i32
  }
}

</mosaic_0001>

<bundles_post_ra>
// kernel: tpu_custom_call.1
= control target key start
LH: loop header
LB: loop body
LE: loop exit
PB: predicated region body
PF: predicated region fallthrough
CT: control target
= control target key end

     0   :  { %s1229_s0 = inlined_call_operand.vmem [shape: s32[16,1], index: 0, kind: input, shape index: {}]   ;;  %s1230_s1 = inlined_call_operand.vmem [shape: f32[16,16], index: 1, kind: input, shape index: {}]   ;;  %s1231_s2 = inlined_call_operand.hbm [shape: f32[16,16], index: 2, kind: input, shape index: {}]   ;;  %s1232_s3 = inlined_call_operand.hbm [shape: f32[16,16], index: 3, kind: input, shape index: {}]   ;;  %s1233_s4 = inlined_call_operand.hbm [shape: f32[16,32], index: 4, kind: input, shape index: {}]   ;;  %s1234_s5 = inlined_call_operand.hbm [shape: f32[1,1], index: 5, kind: output, shape index: {0}]   ;;  %s1235_s6 = inlined_call_operand.hbm [shape: f32[1,1], index: 6, kind: output, shape index: {1}]  }
   0x1   :  { %1239 = sst [smem:[#allocation17_spill]] %s1232_s3 }
   0x2   :  { %12 = vsyncpa [#allocation4], 0 }
   0x3   :  { %14 = vsyncpa [#allocation4 + $0x1], 0 }
   0x4   :  { %15 = vsyncpa [#allocation7], 0 }
   0x5   :  { %17 = vsyncpa [#allocation7 + $0x1], 0 }
   0x6   :  { %18 = vsyncpa [#allocation5], 0 }
   0x7   :  { %19 = vsyncpa [#allocation11], 0  ;;  %s999_s21 = smov 0   ;;  %s1001_s22 = smov 0  }
   0x8   :  { %s1003_s23 = smov 0   ;;  %s1005_s24 = smov 0  }
   0x9 LB: > { %s1018_s25 = sadd.s32 4294967295, %s954_s24   ;;  %s1021_s26 = sadd.s32 1, %s954_s24   ;;  %s954_s24 = sphi %s1005_s24, %s1257_s24   ;;  %s950_s23 = sphi %s1003_s23, %s1256_s23   ;;  %s946_s22 = sphi %s1001_s22, %s1255_s22   ;;  %s942_s21 = sphi %s999_s21, %s1254_s21  }
   0xa   : > { %s81_s27 = ssub.s32 %s954_s24, %s1021_s26  ;;  %s84_s28 = sadd.s32 1, %s950_s23 }
   0xb   : > { %p82_p0 = scmp.eq.s32.totalorder %s81_s27, 0  ;;  %p91_p1 = scmp.ne.s32.totalorder %s950_s23, %s946_s22 }
   0xc   : > { %p92_p2 = scmp.eq.s32.totalorder %s954_s24, 0  ;;  %p97_p3 = scmp.ne.s32.totalorder %s946_s22, %s942_s21 }
   0xd   : > { %s1031_s29 = scalar_select %p82_p0, %s950_s23, %s84_s28  }
   0xe   : > { %p93_p4 = por %p92_p2, %p91_p1  ;;  %p1236_p5 = scmp.eq.s32.totalorder %s1018_s25, 0 }
   0xf   : > { %1240 = sst [smem:[#allocation16_spill]] %s1031_s29  ;;  %p734_p6 = scmp.lt.s32.totalorder %s954_s24, 2 }
  0x10   : > { %p1037_p7 = por %p1236_p5, %p97_p3  ;;  %s1237_s7 = sand.u32 1, %s950_s23  }
  0x11   : > { %s1044_s8 = sshll.u32 %s1237_s7, 3  ;;  %s1047_s9 = sshll.u32 %s954_s24, 7 }
  0x12   : > { %s1241_s30 = scalar_select %p1037_p7, 1, 0 }
  0x13   : > { %p1049_p8 = pnand %p734_p6, %p93_p4  ;;  %s247_s11 = sand.u32 1, %s954_s24  }
  0x14   : > { %s1243_s3 = sld [smem:[#allocation17_spill]]  ;;  %s251_s15 = scalar_lea.vmem [#allocation6], %s1044_s8 }
  0x15   : > { %s258_s16 = sshll.u32 %s251_s15, 4  ;;  %s1063_s17 = scalar_lea.sflag [#allocation7], %s247_s11  ;;  %s259_s16 = int_to_ptr.vmem [resolvable:$true] %s258_s16 }
  0x16   : > { %p1069_p12 = pneg %p1049_p8 }
  0x1a   : > { %s1058_s14 = scalar_lea.hbm %s1243_s3, %s1047_s9  ;;  %s809_s27 = scalar_lea.hbm %s1243_s3, 256 }
  0x1b   : > { %s804_s18 = scalar_lea.hbm %s1058_s14, 128  ;;  %p810_p1 = scmp.lt.s32.totalorder %s1058_s14, %s1243_s3 }
  0x1c   : > { %p805_p11 = scmp.ne.s32.totalorder %s1058_s14, %s804_s18  ;;  %p811_p2 = scmp.lt.s32.totalorder %s809_s27, %s804_s18 }
  0x1e   : > { %p807_p13 = pnand %p1069_p12, %p805_p11  ;;  %p812_p3 = por %p811_p2, %p810_p1 }
  0x20   : > { %p808_p0 = pneg %p807_p13 }
  0x22   : > { %p813_p4 = pnand %p812_p3, %p808_p0 }
  0x24   : > { %816 = shalt.err (!%p813_p4)
}
  0x25   : > { %s817_s11 = scalar_lea.vmem %s259_s16, 128  ;;  %s956_s13 = smov [#allocation6]  }
  0x26   : > { %p818_p6 = scmp.ne.s32.totalorder %s259_s16, %s817_s11  ;;  %s822_s15 = sshll.u32 %s956_s13, 4  ;;  %s823_s15 = int_to_ptr.vmem [resolvable:$false] %s822_s15 }
  0x27   : > { %s824_s7 = scalar_lea.vmem %s823_s15, 256  ;;  %p825_p11 = scmp.lt.s32.totalorder %s259_s16, %s823_s15 }
  0x28   : > { %p820_p5 = pnand %p818_p6, %p1069_p12  ;;  %p826_p13 = scmp.lt.s32.totalorder %s824_s7, %s817_s11 }
  0x2a   : > { %p821_p9 = pneg %p820_p5  ;;  %p827_p10 = por %p826_p13, %p825_p11 }
  0x2c   : > { %p828_p7 = pnand %p827_p10, %p821_p9 }
  0x2e   : > { %831 = shalt.err (!%p828_p7)
}
  0x2f   : > { %730 = dma.hbm_to_vmem [thread:$0]  (!%p1049_p8), %s1058_s14, 128, %s259_s16, %s1063_s17  }
  0x30   : > { %p1245_p5 = scmp.lt.s32.totalorder %s954_s24, 3  ;;  %p1246_p0 = scmp.ge.s32.totalorder %s954_s24, 1 }
  0x31   : > { %s1100_s21 = scalar_lea.hbm %s1231_s2, %s1047_s9  ;;  %s233_s27 = scalar_lea.vmem [#allocation3], %s1044_s8 }
  0x32   : > { %p1092_p1 = pnand %p1246_p0, %p1245_p5  ;;  %s240_s28 = sshll.u32 %s233_s27, 4  ;;  %s241_s28 = int_to_ptr.vmem [resolvable:$true] %s240_s28 }
  0x33   : > { %s1107_s14 = scalar_lea.hbm %s1233_s4, %s1047_s9  ;;  %s1248_s24 = sand.u32 1, %s950_s23  }
  0x34   : > { %s1247_s18 = scalar_select %p1092_p1, 1, 0 }
  0x35   : > { %s230_s16 = scalar_lea.sflag [#allocation4], %s1248_s24  ;;  %s832_s13 = scalar_lea.hbm %s1100_s21, 128 }
  0x36   : > { %p833_p7 = scmp.ne.s32.totalorder %s1100_s21, %s832_s13  ;;  %s837_s20 = scalar_lea.hbm %s1231_s2, 256 }
  0x37   : > { %p838_p2 = scmp.lt.s32.totalorder %s1100_s21, %s1231_s2  ;;  %p839_p3 = scmp.lt.s32.totalorder %s837_s20, %s832_s13 }
  0x38   : > { %p835_p9 = pnand %p833_p7, %p1069_p12 }
  0x39   : > { %p840_p4 = por %p839_p3, %p838_p2 }
  0x3a   : > { %p836_p10 = pneg %p835_p9 }
  0x3c   : > { %p841_p6 = pnand %p840_p4, %p836_p10 }
  0x3e   : > { %844 = shalt.err (!%p841_p6)
}
  0x3f   : > { %s845_s9 = scalar_lea.vmem %s241_s28, 128  ;;  %s957_s27 = smov [#allocation3]  }
  0x40   : > { %p846_p11 = scmp.ne.s32.totalorder %s241_s28, %s845_s9  ;;  %s850_s12 = sshll.u32 %s957_s27, 4  ;;  %s851_s12 = int_to_ptr.vmem [resolvable:$false] %s850_s12 }
  0x41   : > { %s852_s11 = scalar_lea.vmem %s851_s12, 256  ;;  %p853_p0 = scmp.lt.s32.totalorder %s241_s28, %s851_s12 }
  0x42   : > { %p848_p13 = pnand %p846_p11, %p1069_p12  ;;  %p854_p7 = scmp.lt.s32.totalorder %s852_s11, %s845_s9 }
  0x44   : > { %p849_p5 = pneg %p848_p13  ;;  %p855_p9 = por %p854_p7, %p853_p0 }
  0x46   : > { %p856_p1 = pnand %p855_p9, %p849_p5 }
  0x48   : > { %859 = shalt.err (!%p856_p1)
}
  0x49   : > { %727 = dma.hbm_to_vmem [thread:$0]  (!%p1049_p8), %s1100_s21, 128, %s241_s28, %s230_s16  }
  0x4a   : > { %s269_s3 = scalar_lea.vmem [#allocation8], %s1044_s8  ;;  %s860_s24 = scalar_lea.hbm %s1107_s14, 128 }
  0x4b   : > { %s276_s29 = sshll.u32 %s269_s3, 4  ;;  %p861_p10 = scmp.ne.s32.totalorder %s1107_s14, %s860_s24  ;;  %s277_s29 = int_to_ptr.vmem [resolvable:$true] %s276_s29 }
  0x4c   : > { %s865_s7 = scalar_lea.hbm %s1233_s4, 256  ;;  %p866_p1 = scmp.lt.s32.totalorder %s1107_s14, %s1233_s4 }
  0x4d   : > { %p863_p2 = pnand %p861_p10, %p1069_p12  ;;  %p867_p4 = scmp.lt.s32.totalorder %s865_s7, %s860_s24 }
  0x4f   : > { %p864_p3 = pneg %p863_p2  ;;  %p868_p6 = por %p867_p4, %p866_p1 }
  0x51   : > { %p869_p11 = pnand %p868_p6, %p864_p3 }
  0x53   : > { %872 = shalt.err (!%p869_p11)
}
  0x54   : > { %s873_s8 = scalar_lea.vmem %s277_s29, 128  ;;  %s958_s21 = smov [#allocation8]  }
  0x55   : > { %p874_p13 = scmp.ne.s32.totalorder %s277_s29, %s873_s8  ;;  %s878_s28 = sshll.u32 %s958_s21, 4  ;;  %s879_s28 = int_to_ptr.vmem [resolvable:$false] %s878_s28 }
  0x56   : > { %s880_s16 = scalar_lea.vmem %s879_s28, 256  ;;  %p881_p7 = scmp.lt.s32.totalorder %s277_s29, %s879_s28 }
  0x57   : > { %p876_p5 = pnand %p874_p13, %p1069_p12  ;;  %p882_p9 = scmp.lt.s32.totalorder %s880_s16, %s873_s8 }
  0x59   : > { %p877_p0 = pneg %p876_p5  ;;  %p883_p10 = por %p882_p9, %p881_p7 }
  0x5b   : > { %p884_p2 = pnand %p883_p10, %p877_p0 }
  0x5d   : > { %887 = shalt.err (!%p884_p2)
}
  0x5e   : > { %733 = dma.hbm_to_vmem [thread:$0]  (!%p1049_p8), %s1107_s14, 128, %s277_s29, %s1063_s17  }
  0x5f   : > { %p1249_p3 = scmp.ne.s32.totalorder %s1247_s18, 0 }
  0x60   : > { %s287_s19 = sand.u32 (!%p1249_p3), 1, %s946_s22   ;;  %p1250_p12 = scmp.ne.s32.totalorder (!%p1249_p3), %s1241_s30, 0 }
  0x61   : > { %285 = sbr.rel (%p1249_p3) target bundleno = 688 (0x2b0), region = 40  ;;  %s1148_s27 = sshll.u32 (!%p1249_p3), %s287_s19, 3 }
  0x62   : > { %s288_s12 = scalar_lea.sflag (!%p1249_p3), [#allocation4], %s287_s19  ;;  %s291_s11 = scalar_lea.vmem (!%p1249_p3), [#allocation3], %s1148_s27 }
  0x66   : > { %925 = dma.done.wait (%p1250_p12), %s288_s12, 128  }
  0x67   : > { %927 = vsyncadd (%p1250_p12), %s288_s12, 4294967168  ;;  %s296_s10 = sand.u32 1, %s1018_s25   ;;  %s300_s18 = scalar_lea.vmem [#allocation6], %s1148_s27 }
  0x68   : > { %s297_s17 = scalar_lea.sflag [#allocation7], %s296_s10 }
  0x69   : > { %929 = dma.done.wait (%p1250_p12), %s297_s17, 256  }
  0x6a   : > { %931 = vsyncadd (%p1250_p12), %s297_s17, 4294967040  ;;  %p351_p8 = scmp.lt.s32.totalorder %s1018_s25, 1  ;;  %v959_v0 = vmov 0   ;;  %vm381_vm0 = vcmask 130048   ;;  %v399_v1 = vld [vmem:[%s291_s11] sm:$0xff]  ;;  %v418_v2 = vld [vmem:[%s300_s18] sm:$0xff]  ;;  %v368_v23 = vlaneseq }
  0x6b   : > { %778 = vset.pattern.permute.xlu1 %v959_v0  ;;  %779 = vset.pattern.permute.xlu0 %v959_v0  ;;  %v400_v4 = vsel %vm381_vm0, %v399_v1, -inf  ;;  %v419_v6 = vsel %vm381_vm0, %v418_v2, -inf  ;;  %s309_s20 = scalar_lea.vmem [#allocation8], %s1148_s27  ;;  %vm453_vm1 = vcmask 261120   ;;  %v960_v10 = vmov 0.0   ;;  %s689_s9 = sshll.u32 %s1018_s25, 3 }
  0x6c   : > { %s352_s14 = scalar_select %p351_p8, %s1018_s25, 1  ;;  %401 = vmax.xlane.f32.xlu0 %v400_v4  ;;  %v451_v8 = vld [vmem:[%s309_s20] sm:$0xff]  ;;  %v369_v25 = vand.u32 127, %v368_v23  ;;  %vm488_vm9 = vcmask 7168  }
  0x6d   : > { %v452_v9 = vand.u32 2147483647, %v451_v8  ;;  %v457_v13 = vmul.f32 %v451_v8, %v451_v8  ;;  %s961_s8 = smov 0.0   ;;  %p1251_p1 = scmp.eq.s32.totalorder %s1018_s25, 0 }
  0x6e   : > { %s686_s3 = sshll.u32 %s352_s14, 3  ;;  %p736_p6 = scmp.eq.s32.totalorder %s1018_s25, 1 }
  0x6f   : > { %s358_s13 = scalar_lea.vmem %s1230_s1, %s686_s3  ;;  %s354_s7 = scalar_lea.vmem %s1229_s0, %s686_s3  ;;  %vm469_vm2 = vcmp.gt.f32.partialorder %v452_v9, 0.0  ;;  %v458_v14 = vsel %vm453_vm1, %v457_v13, 0.0  ;;  %v454_v15 = vsel %vm453_vm1, %v452_v9, 0.0 }
  0x70   : > { %v380_v3 = vld [vmem:[%s358_s13] sm:$0xff]  ;;  %420 = vmax.xlane.f32.xlu0 %v419_v6  ;;  %v690_v11 = vsel %vm469_vm2, 1.0, %v960_v10  ;;  %711 = sst [smem:[#allocation2]] (%p1251_p1), %s961_s8  ;;  %p1252_p4 = pmov %p1251_p1 }
  0x71   : > { %v382_v5 = vsel %vm381_vm0, %v380_v3, -inf  ;;  %v367_v7 = vld [vmem:[%s354_s7] sm:$0xff]  ;;  %v472_v12 = vsel %vm453_vm1, %v690_v11, 0.0  ;;  %s486_s21 = sld [smem:[#allocation2]]  ;;  %s962_s17 = smov [#allocation9]  }
  0x72   : > { %383 = vmax.xlane.f32.xlu1 %v382_v5  ;;  %712 = sst [smem:[#allocation2 + $0x1]] (%p1252_p4), %s961_s8  ;;  %s963_s29 = smov [#allocation10]  }
  0x73   : > { %s691_s28 = sld [smem:[#allocation2 + $0x1]] }
  0x83   : > { %371 = vperm.xlu1 %778, %v367_v7  }
  0xa7   : > { %459 = vadd.xlane.f32.xlu1 %v458_v14 }
  0xf5   : > { %v402_v16 = vpop.xlane.xlu0 %401 }
  0xf6   : > { %v403_v17 = vsub.f32 %v399_v1, %v402_v16 }
  0xf8   : > { %v404_v18 = vmul.f32 1.442695, %v403_v17 }
  0xf9   : > { %v421_v19 = vpop.xlane.xlu0 %420 }
  0xfa   : > { %780 = vpow2.f32 %v404_v18  ;;  %v422_v20 = vsub.f32 %v418_v2, %v421_v19  ;;  %v375_v18 = vshrl.u32 %v368_v23, 7 }
  0xfb   : > { %v1173_v22 = vpop.xlane.xlu1 %383 }
  0xfc   : > { %v423_v21 = vmul.f32 1.442695, %v422_v20  ;;  %v385_v24 = vsub.f32 %v380_v3, %v1173_v22  ;;  %v377_v20 = vstv %s689_s9 }
  0xfe   : > { %782 = vpow2.f32 %v423_v21  ;;  %v386_v27 = vmul.f32 1.442695, %v385_v24 }
  0xff   : > { %v372_v26 = vpop.permute.xlu1 %371 }
 0x100   : > { %vm373_vm3 = vcmp.eq.s32.totalorder %v369_v25, %v372_v26  ;;  %784 = vpow2.f32 %v386_v27 }
 0x101   : > { %v412_v31 = vsel %vm373_vm3, %v399_v1, 0.0  ;;  %v431_v34 = vsel %vm373_vm3, %v418_v2, 0.0  ;;  %v394_v38 = vsel %vm373_vm3, %v380_v3, 0.0 }
 0x102   : > { %v413_v33 = vsel %vm381_vm0, %v412_v31, 0.0  ;;  %v432_v35 = vsel %vm381_vm0, %v431_v34, 0.0  ;;  %v395_v39 = vsel %vm381_vm0, %v394_v38, 0.0 }
 0x107   : > { %v781_v28 = vpop.eup %780 }
 0x108   : > { %v406_v29 = vsel %vm381_vm0, %v781_v28, 0.0  ;;  %v378_v28 = vadd.s32 %v377_v20, %v375_v18 }
 0x109   : > { %407 = vadd.xlane.f32.xlu0 %v406_v29 }
 0x10a   : > { %vm379_vm8 = vcmp.lt.s32.totalorder %v378_v28, 16 }
 0x10b   : > { %v783_v30 = vpop.eup %782 }
 0x10c   : > { %v425_v32 = vsel %vm381_vm0, %v783_v30, 0.0 }
 0x10d   : > { %426 = vadd.xlane.f32.xlu0 %v425_v32  ;;  %v785_v36 = vpop.eup %784 }
 0x10e   : > { %v388_v37 = vsel %vm381_vm0, %v785_v36, 0.0 }
 0x111   : > { %414 = vadd.xlane.f32.xlu0 %v413_v33 }
 0x115   : > { %433 = vadd.xlane.f32.xlu0 %v432_v35 }
 0x119   : > { %473 = vadd.xlane.f32.xlu0 %v472_v12 }
 0x11d   : > { %389 = vadd.xlane.f32.xlu0 %v388_v37 }
 0x121   : > { %396 = vadd.xlane.f32.xlu0 %v395_v39 }
 0x125   : > { %455 = vadd.xlane.f32.xlu0 %v454_v15 }
 0x130   : > { %v460_v44 = vpop.xlane.xlu1 %459 }
 0x131   : > { %vm463_vm5 = vcmp.eq.f32.partialorder %v460_v44, inf  ;;  %v466_v62 = vand.u32 2147483648, %v460_v44  ;;  %vm465_vm7 = vcmp.eq.f32.partialorder %v460_v44, 0.0 }
 0x192   : > { %v408_v40 = vpop.xlane.xlu0 %407 }
 0x193   : > { %786 = vlog2.f32 %v408_v40 }
 0x196   : > { %v427_v41 = vpop.xlane.xlu0 %426 }
 0x197   : > { %788 = vlog2.f32 %v427_v41 }
 0x198   : > { %790 = vrsqrt.f32 %v460_v44 }
 0x19a   : > { %v415_v42 = vpop.xlane.xlu0 %414 }
 0x19e   : > { %v434_v43 = vpop.xlane.xlu0 %433 }
 0x1a0   : > { %v787_v45 = vpop.eup %786 }
 0x1a1   : > { %v410_v46 = vmul.f32 0.6931472, %v787_v45 }
 0x1a2   : > { %v474_v47 = vpop.xlane.xlu0 %473 }
 0x1a3   : > { %v411_v48 = vadd.f32 %v410_v46, %v402_v16  ;;  %792 = vrsqrt.f32 %v474_v47  ;;  %vm477_vm4 = vcmp.eq.f32.partialorder %v474_v47, inf  ;;  %v480_v61 = vand.u32 2147483648, %v474_v47 }
 0x1a4   : > { %v789_v49 = vpop.eup %788  ;;  %vm479_vm6 = vcmp.eq.f32.partialorder %v474_v47, 0.0 }
 0x1a5   : > { %v429_v50 = vmul.f32 0.6931472, %v789_v49  ;;  %v417_v51 = vsub.f32 %v415_v42, %v411_v48  ;;  %v791_v56 = vpop.eup %790  ;;  %v416_v17 = vsub.f32 %v411_v48, %v415_v42 }
 0x1a6   : > { %v390_v57 = vpop.xlane.xlu0 %389  ;;  %v462_v60 = vmul.f32 %v791_v56, %v460_v44 }
 0x1a7   : > { %v437_v52 = vmul.f32 1.442695, %v417_v51  ;;  %v430_v53 = vadd.f32 %v429_v50, %v421_v19 }
 0x1a8   : > { %v464_v0 = vsel %vm463_vm5, %v460_v44, %v462_v60 }
 0x1a9   : > { %v436_v54 = vsub.f32 %v434_v43, %v430_v53  ;;  %794 = vpow2.f32 %v437_v52  ;;  %v467_v3 = vsel %vm465_vm7, %v466_v62, %v464_v0  ;;  %v435_v24 = vsub.f32 %v430_v53, %v434_v43 }
 0x1aa   : > { %v468_v8 = vmax.f32 %v467_v3, 1e-08  ;;  %v397_v15 = vpop.xlane.xlu0 %396 }
 0x1ab   : > { %v440_v55 = vmul.f32 1.442695, %v436_v54 }
 0x1ad   : > { %796 = vpow2.f32 %v440_v55 }
 0x1ae   : > { %798 = vlog2.f32 %v390_v57  ;;  %v456_v27 = vpop.xlane.xlu0 %455 }
 0x1b0   : > { %v793_v58 = vpop.eup %792 }
 0x1b1   : > { %v476_v59 = vmul.f32 %v793_v58, %v474_v47 }
 0x1b3   : > { %v478_v63 = vsel %vm477_vm4, %v474_v47, %v476_v59 }
 0x1b4   : > { %v481_v2 = vsel %vm479_vm6, %v480_v61, %v478_v63 }
 0x1b5   : > { %v482_v7 = vmax.f32 %v481_v2, 1e-08 }
 0x1b6   : > { %v795_v1 = vpop.eup %794 }
 0x1b7   : > { %v439_v5 = vmul.f32 0.5, %v795_v1  ;;  %v483_v12 = vmul.f32 %v482_v7, %v468_v8 }
 0x1ba   : > { %v797_v4 = vpop.eup %796 }
 0x1bb   : > { %v442_v6 = vmul.f32 0.5, %v797_v4  ;;  %v799_v10 = vpop.eup %798 }
 0x1bc   : > { %v392_v13 = vmul.f32 0.6931472, %v799_v10 }
 0x1bd   : > { %v443_v9 = vadd.f32 %v442_v6, %v439_v5 }
 0x1be   : > { %v393_v14 = vadd.f32 %v392_v13, %v1173_v22 }
 0x1bf   : > { %v444_v11 = vmax.f32 %v443_v9, 1e-07 }
 0x1c0   : > { %v398_v16 = vsub.f32 %v393_v14, %v397_v15 }
 0x1c1   : > { %800 = vlog2.f32 %v444_v11 }
 0x1c2   : > { %802 = vrcp.f32 %v483_v12  ;;  %v448_v19 = vadd.f32 %v416_v17, %v398_v16 }
 0x1c4   : > { %v449_v29 = vadd.f32 %v448_v19, %v435_v24 }
 0x1ce   : > { %v801_v21 = vpop.eup %800 }
 0x1cf   : > { %v446_v25 = vmul.f32 0.6931472, %v801_v21  ;;  %v803_v26 = vpop.eup %802 }
 0x1d0   : > { %v485_v31 = vmul.f32 %v803_v26, %v456_v27 }
 0x1d1   : > { %v447_v30 = vsub.f32 0.0, %v446_v25 }
 0x1d2   : > { %v503_v23 = vsel %vm379_vm8, %v485_v31, 0.0 }
 0x1d3   : > { %v450_v22 = vadd.f32 %v449_v29, %v447_v30  ;;  %v504_v34 = vsel %vm488_vm9, %v503_v23, 0.0 }
 0x1d5   : > { %v487_v32 = vsel %vm379_vm8, %v450_v22, 0.0 }
 0x1d6   : > { %v489_v33 = vsel %vm488_vm9, %v487_v32, 0.0 }
 0x1d7   : > { %490 = vadd.xlane.f32.xlu0 %v489_v33 }
 0x1db   : > { %505 = vadd.xlane.f32.xlu0 %v504_v34 }
 0x260   : > { %v491_v35 = vpop.xlane.xlu0 %490 }
 0x261   : > { %v492_v36 = vrot.slane %v491_v35, 4 }
 0x263   : > { %v493_v37 = vadd.f32 %v492_v36, %v491_v35 }
 0x264   : > { %v506_v38 = vpop.xlane.xlu0 %505 }
 0x265   : > { %v494_v39 = vrot.slane %v493_v37, 2  ;;  %v507_v40 = vrot.slane %v506_v38, 4 }
 0x267   : > { %v508_v41 = vadd.f32 %v507_v40, %v506_v38  ;;  %v495_v42 = vadd.f32 %v494_v39, %v493_v37 }
 0x269   : > { %v509_v43 = vrot.slane %v508_v41, 2  ;;  %v496_v44 = vrot.slane %v495_v42, 1 }
 0x26b   : > { %v510_v45 = vadd.f32 %v509_v43, %v508_v41  ;;  %v497_v46 = vadd.f32 %v496_v44, %v495_v42 }
 0x26d   : > { %700 = vpush %v497_v46  ;;  %v511_v47 = vrot.slane %v510_v45, 1 }
 0x26f   : > { %v512_v48 = vadd.f32 %v511_v47, %v510_v45 }
 0x271   : > { %702 = vpush %v512_v48 }
 0x29e   : > { %s701_s16 = spop %700 }
 0x29f   : > { %s499_s19 = sadd.f32 %s701_s16, %s486_s21 }
 0x2a1   : > { %501 = sst [smem:[#allocation2]] %s499_s19  ;;  %s522_s27 = smul.f32 0.0625, %s499_s19 }
 0x2a2   : > { %s703_s12 = spop %702 }
 0x2a3   : > { %s514_s11 = sadd.f32 %s703_s12, %s691_s28 }
 0x2a4   : > { %714 = sst [smem:[#allocation9]] (%p736_p6), %s522_s27 }
 0x2a5   : > { %516 = sst [smem:[#allocation2 + $0x1]] %s514_s11  ;;  %s526_s10 = smul.f32 0.0625, %s514_s11 }
 0x2a6   : > { %717 = dma.smem_to_hbm (%p736_p6), %s962_s17, 16, %s1234_s5, [#allocation5]  }
 0x2a7   : > { %s527_s3 = ssub.f32 1.0, %s526_s10 }
 0x2a9   : > { %715 = sst [smem:[#allocation10]] (%p736_p6), %s527_s3 }
 0x2aa   : > { %719 = dma.smem_to_hbm (%p736_p6), %s963_s29, 16, %s1235_s6, [#allocation11]  }
 0x2ab   : > { %933 = dma.done.wait (%p736_p6), [#allocation5], 16  }
 0x2ac   : > { %935 = vsyncadd (%p736_p6), [#allocation5], 4294967280 }
 0x2ad   : > { %937 = dma.done.wait (%p736_p6), [#allocation11], 16  }
 0x2ae   : > { %939 = vsyncadd (%p736_p6), [#allocation11], 4294967280 }
 0x2af   : > { %556 = sfence }
 0x2b0 PF: > { %s1253_s30 = sld [smem:[#allocation16_spill]]  ;;  %p22_p11 = scmp.ge.s32.totalorder %s1021_s26, 4  }
 0x2b1   : > { %s1254_s21 = smov %s946_s22  ;;  %s1255_s22 = smov %s950_s23 }
 0x2b2   : > { %s1257_s24 = smov %s1021_s26  ;;  %24 = sbr.rel (!%p22_p11) target bundleno = 9 (0x9), region = 129 }
 0x2b6   : > { %s1256_s23 = smov %s1253_s30 }
 0x2b7   :  { %562 = vsyncpa [#allocation4], 1 }
 0x2b8   :  { %564 = vsyncpa [#allocation4 + $0x1], 1 }
 0x2b9   :  { %565 = vsyncpa [#allocation7], 1 }
 0x2ba   :  { %567 = vsyncpa [#allocation7 + $0x1], 1 }
 0x2bb   :  { %568 = vsyncpa [#allocation5], 1 }
 0x2bc   :  { %570 = vsyncpa [#allocation5 + $0x1], 1 }
 0x2bd   :  { %571 = vsyncpa [#allocation11], 1 }

</bundles_post_ra>
